<compile_context>
chip_gen: v7x
topology: tpu7x:2x2x1
jax: 0.10.0
libtpu: 0.0.40
codegen_flags: <defaults>
</compile_context>

<pallas_src>
import functools

import jax
import jax.numpy as jnp
from jax.experimental import pallas as pl
from jax.experimental.pallas import tpu as pltpu

BN_EPS = 1e-5
_FAST_PATH_BYTES = 2 * 1024 * 1024  # fused single-kernel path threshold


@functools.lru_cache(maxsize=None)
def _vmem_limit_bytes():
    """Per-generation scoped-VMEM request: big on v5e/v6e (128 MiB physical),
    conservative on v7x (64 MiB physical)."""
    phys = 64 * 1024 * 1024
    try:
        info = pltpu.get_tpu_info()
        phys = int(getattr(info, "vmem_capacity_bytes", phys))
    except Exception:
        pass
    if phys >= 96 * 1024 * 1024:          # v5e / v6e
        return 64 * 1024 * 1024
    return 40 * 1024 * 1024               # v7x-class: leave pipeline headroom


def _pick_tile_l(l_out, c_in, c_out, read_stride, vmem_limit):
    """Lane-tile size along L_out sized from the real VMEM budget.

    Accounts for double-buffered x (incl. stride expansion), residual and output
    tiles plus the resident folded-weight/shift blocks. Always returns either
    L_out itself or a multiple of 128 that is <= L_out.
    """
    per_col = 2 * 4 * (c_in * read_stride + 2 * c_out)      # f32 worst case, 2 bufs
    resident = 2 * 4 * (c_out * c_in + c_out)                # w_scaled + shift, 2 bufs
    budget = (vmem_limit * 3) // 4 - resident
    t = max(budget // max(per_col, 1), 128)
    t = min(t, 8192)
    if t >= l_out:
        return l_out
    return max(128, (t // 128) * 128)                        # < l_out by construction


# --------------------------------------------------------------------------- #
# Fast path: everything fits in VMEM -> one fused kernel on (C, N*L) views.
# --------------------------------------------------------------------------- #
def _fused_kernel(x_ref, w_ref, b_ref, gamma_ref, beta_ref, res_ref, o_ref, *, m):
    y = jnp.dot(w_ref[...], x_ref[...], preferred_element_type=jnp.float32)
    y = y + b_ref[...]                                        # (Cout, M) f32
    inv_m = 1.0 / m
    mean = jnp.sum(y, axis=1, keepdims=True) * inv_m
    var = jnp.maximum(jnp.sum(y * y, axis=1, keepdims=True) * inv_m - mean * mean, 0.0)
    scale = gamma_ref[...] * jax.lax.rsqrt(var + BN_EPS)
    shift = beta_ref[...] - scale * mean
    out = res_ref[...] + scale * y + shift
    o_ref[...] = jnp.maximum(out, 0.0).astype(o_ref.dtype)


def _fused_small(xs, res, weight, bias, gamma, beta, out_dtype, vmem_limit):
    N, Cin, L_out = xs.shape
    Cout = weight.shape[0]
    M = N * L_out
    # Tiny arrays: channel-major flatten so the kernel sees lane-dense (C, M).
    x2 = jnp.transpose(xs, (1, 0, 2)).reshape(Cin, M)
    r2 = jnp.transpose(res, (1, 0, 2)).reshape(Cout, M)
    w32 = weight.astype(jnp.float32)
    b32 = bias.astype(jnp.float32).reshape(Cout, 1)
    g32 = gamma.astype(jnp.float32).reshape(Cout, 1)
    be32 = beta.astype(jnp.float32).reshape(Cout, 1)

    out2 = pl.pallas_call(
        functools.partial(_fused_kernel, m=M),
        out_shape=jax.ShapeDtypeStruct((Cout, M), out_dtype),
        in_specs=[pl.BlockSpec(memory_space=pltpu.MemorySpace.VMEM)] * 6,
        out_specs=pl.BlockSpec(memory_space=pltpu.MemorySpace.VMEM),
        compiler_params=pltpu.CompilerParams(vmem_limit_bytes=vmem_limit),
        cost_estimate=pl.CostEstimate(
            flops=2 * Cout * Cin * M + 6 * Cout * M,
            transcendentals=Cout,
            bytes_accessed=4 * (Cin * M + 3 * Cout * M),
        ),
    )(x2, w32, b32, g32, be32, r2)
    return out2.reshape(Cout, N, L_out).transpose(1, 0, 2)


# --------------------------------------------------------------------------- #
# Streaming pass 1: per-batch partial  s_x = sum_cols(x),  G = x @ x^T
# (BN stats of y = Wx + b are derived from these outside the kernel.)
# --------------------------------------------------------------------------- #
def _stats_kernel(x_ref, sx_ref, g_ref, *, l_out, tile_l, read_stride):
    l = pl.program_id(1)

    @pl.when(l == 0)
    def _init():
        sx_ref[...] = jnp.zeros_like(sx_ref)
        g_ref[...] = jnp.zeros_like(g_ref)

    if read_stride > 1:
        x = x_ref[:, pl.ds(0, tile_l, stride=read_stride)]    # in-kernel subsample
    else:
        x = x_ref[...]                                         # (Cin, tL)

    if l_out % tile_l != 0:                                    # ragged last tile only
        col = jax.lax.broadcasted_iota(jnp.int32, x.shape, 1)
        valid = l_out - l * tile_l
        x = jnp.where(col < valid, x, jnp.zeros_like(x))

    sx_ref[...] += jnp.sum(x.astype(jnp.float32), axis=1, keepdims=True)
    g_ref[...] += jax.lax.dot_general(
        x, x, (((1,), (1,)), ((), ())), preferred_element_type=jnp.float32)


# --------------------------------------------------------------------------- #
# Streaming pass 2: out = relu(res + (scale*W) @ x + shift), NCW tiles.
# --------------------------------------------------------------------------- #
def _apply_kernel(x_ref, ws_ref, shift_ref, res_ref, o_ref, *, tile_l, read_stride):
    if read_stride > 1:
        x = x_ref[:, pl.ds(0, tile_l, stride=read_stride)]
    else:
        x = x_ref[...]
    y = jnp.dot(ws_ref[...], x, preferred_element_type=jnp.float32)   # (Cout, tL)
    out = y + shift_ref[...] + res_ref[...]
    o_ref[...] = jnp.maximum(out, 0.0).astype(o_ref.dtype)


@functools.partial(jax.jit, static_argnames=("stride",))
def shortcut_layer(input_tensor, out_tensor, weight, bias, gamma, beta, *, stride=1):
    """input_tensor: (N, Cin, L); out_tensor: (N, Cout, L_out) -- NCW layout."""
    N, Cin, L = input_tensor.shape
    Cout = weight.shape[0]
    L_out = (L - 1) // stride + 1
    assert out_tensor.shape == (N, Cout, L_out)
    M = N * L_out

    out_dtype = jnp.result_type(input_tensor.dtype, out_tensor.dtype, weight.dtype)
    vmem_limit = _vmem_limit_bytes()

    # ---------------- small-problem fused fast path ----------------
    fast_bytes = 4 * (Cin * M + 3 * Cout * M)
    if fast_bytes <= _FAST_PATH_BYTES:
        xs_small = input_tensor if stride == 1 else input_tensor[:, :, ::stride]
        return _fused_small(xs_small, out_tensor, weight, bias, gamma, beta,
                            out_dtype, vmem_limit)

    # ---------------- streaming path: stride & tile selection ----------------
    use_inkernel_stride = stride == 2
    tL = _pick_tile_l(L_out, Cin, Cout, 2 if use_inkernel_stride else 1, vmem_limit)
    if use_inkernel_stride and not (tL % 64 == 0 or 2 * tL == L):
        use_inkernel_stride = False            # x block would violate (8,128) rule

    if stride == 1:
        xs, x_block_l, read_stride = input_tensor, tL, 1
    elif use_inkernel_stride:
        xs, x_block_l, read_stride = input_tensor, 2 * tL, 2
    else:
        # TODO(synk): stride>2 still uses one XLA strided slice over the input.
        xs, x_block_l, read_stride = input_tensor[:, :, ::stride], tL, 1
    nLt = pl.cdiv(L_out, tL)

    # ---------------- pass 1: per-batch x statistics ----------------
    sx_parts, g_parts = pl.pallas_call(
        functools.partial(_stats_kernel, l_out=L_out, tile_l=tL, read_stride=read_stride),
        out_shape=(
            jax.ShapeDtypeStruct((N, Cin, 1), jnp.float32),
            jax.ShapeDtypeStruct((N, Cin, Cin), jnp.float32),
        ),
        grid=(N, nLt),
        in_specs=[pl.BlockSpec((None, Cin, x_block_l), lambda n, l: (n, 0, l))],
        out_specs=(
            pl.BlockSpec((None, Cin, 1), lambda n, l: (n, 0, 0)),
            pl.BlockSpec((None, Cin, Cin), lambda n, l: (n, 0, 0)),
        ),
        compiler_params=pltpu.CompilerParams(
            dimension_semantics=("parallel", "arbitrary"),
            vmem_limit_bytes=vmem_limit,
        ),
        cost_estimate=pl.CostEstimate(
            flops=2 * Cin * (Cin + 1) * M,
            transcendentals=0,
            bytes_accessed=4 * (N * Cin * xs.shape[2] + N * Cin * (Cin + 1)),
        ),
    )(xs)

    # ---------------- fold BN (training stats) into per-channel scale/shift ----
    sx = jnp.sum(sx_parts, axis=0)[:, 0]                      # (Cin,)
    G = jnp.sum(g_parts, axis=0)                              # (Cin, Cin)
    w32 = weight.astype(jnp.float32)
    b32 = bias.astype(jnp.float32)
    w_sx = w32 @ sx                                           # (Cout,)
    sum_y = w_sx + M * b32
    sum_y2 = jnp.sum((w32 @ G) * w32, axis=1) + 2.0 * b32 * w_sx + M * b32 * b32
    mean = sum_y / M
    var = jnp.maximum(sum_y2 / M - mean * mean, 0.0)          # biased (training) var
    scale = gamma.astype(jnp.float32) * jax.lax.rsqrt(var + BN_EPS)
    shift = (beta.astype(jnp.float32) + scale * (b32 - mean)).reshape(Cout, 1)
    w_scaled = (w32 * scale[:, None]).astype(xs.dtype)        # native MXU dtype

    # ---------------- pass 2: normalize + residual + ReLU ----------------
    out = pl.pallas_call(
        functools.partial(_apply_kernel, tile_l=tL, read_stride=read_stride),
        out_shape=jax.ShapeDtypeStruct((N, Cout, L_out), out_dtype),
        grid=(N, nLt),
        in_specs=[
            pl.BlockSpec((None, Cin, x_block_l), lambda n, l: (n, 0, l)),  # x, NCW
            pl.BlockSpec((Cout, Cin), lambda n, l: (0, 0)),                # scale*W
            pl.BlockSpec((Cout, 1), lambda n, l: (0, 0)),                  # shift
            pl.BlockSpec((None, Cout, tL), lambda n, l: (n, 0, l)),        # residual
        ],
        out_specs=pl.BlockSpec((None, Cout, tL), lambda n, l: (n, 0, l)),
        compiler_params=pltpu.CompilerParams(
            dimension_semantics=("parallel", "parallel"),
            vmem_limit_bytes=vmem_limit,
        ),
        cost_estimate=pl.CostEstimate(
            flops=2 * Cout * Cin * M,
            transcendentals=0,
            bytes_accessed=4 * (N * Cin * xs.shape[2] + 2 * Cout * M + Cout * (Cin + 1)),
        ),
    )(xs, w_scaled, shift, out_tensor)

    return out


def _reference(input_tensor, out_tensor, weight, bias, gamma, beta, stride):
    """Plain-JAX reference of the PyTorch forward (training-mode BN)."""
    xs = input_tensor[:, :, ::stride]
    y = jnp.einsum("oc,ncl->nol", weight, xs) + bias[None, :, None]
    mean = y.mean(axis=(0, 2), keepdims=True)
    var = ((y - mean) ** 2).mean(axis=(0, 2), keepdims=True)
    y_hat = (y - mean) * jax.lax.rsqrt(var + BN_EPS)
    y_hat = y_hat * gamma[None, :, None] + beta[None, :, None]
    return jnp.maximum(out_tensor + y_hat, 0.0)


if __name__ == "__main__":
    def run_case(N, Cin, Cout, L, stride, seed):
        key = jax.random.PRNGKey(seed)
        kx, kr, kw, kb, kg, kbeta = jax.random.split(key, 6)
        L_out = (L - 1) // stride + 1
        x = jax.random.normal(kx, (N, Cin, L), dtype=jnp.float32)
        res = jax.random.normal(kr, (N, Cout, L_out), dtype=jnp.float32)
        w = jax.random.normal(kw, (Cout, Cin), dtype=jnp.float32) * 0.1
        b = jax.random.normal(kb, (Cout,), dtype=jnp.float32) * 0.1
        g = 1.0 + 0.1 * jax.random.normal(kg, (Cout,), dtype=jnp.float32)
        be = 0.1 * jax.random.normal(kbeta, (Cout,), dtype=jnp.float32)

        out = jax.block_until_ready(shortcut_layer(x, res, w, b, g, be, stride=stride))
        ref = _reference(x, res, w, b, g, be, stride)
        assert out.shape == (N, Cout, L_out)
        assert jnp.allclose(out, ref, rtol=1e-2, atol=1e-2), \
            f"mismatch vs JAX reference for case {(N, Cin, Cout, L, stride)}"

    # Small shape consistent with the module (fused single-kernel fast path).
    run_case(2, 4, 8, 256, 2, seed=0)
    # Moderate shape exercising the two-pass streaming path: multiple lane
    # tiles, ragged last tile, and the in-kernel stride-2 subsample.
    run_case(2, 4, 8, 32000, 2, seed=1)

    print("KERNEL_OK")
</pallas_src>

<mosaic_0001>
module attributes {stable_mosaic.version = 11 : i64} {
  func.func @_fused_kernel(%arg0: memref<4x256xf32, #tpu.memory_space<vmem>>, %arg1: memref<8x4xf32, #tpu.memory_space<vmem>>, %arg2: memref<8x1xf32, #tpu.memory_space<vmem>>, %arg3: memref<8x1xf32, #tpu.memory_space<vmem>>, %arg4: memref<8x1xf32, #tpu.memory_space<vmem>>, %arg5: memref<8x256xf32, #tpu.memory_space<vmem>>, %arg6: memref<8x256xf32, #tpu.memory_space<vmem>>) attributes {dimension_semantics = [], scalar_prefetch = 0 : i64, scratch_operands = 0 : i64, tpu.core_type = #tpu.core_type<tc>} {
    %c0 = arith.constant 0 : index
    %c0_0 = arith.constant 0 : index
    %0 = vector.load %arg1[%c0, %c0_0] : memref<8x4xf32, #tpu.memory_space<vmem>>, vector<8x4xf32>
    %c0_1 = arith.constant 0 : index
    %c0_2 = arith.constant 0 : index
    %1 = vector.load %arg0[%c0_1, %c0_2] : memref<4x256xf32, #tpu.memory_space<vmem>>, vector<4x256xf32>
    %cst = arith.constant dense<0.000000e+00> : vector<8x256xf32>
    %2 = tpu.matmul %0, %1, %cst {dimension_numbers = #tpu.dot_dimension_numbers<[1], [0], [0], [1], [0, 0, 1, 1], [], []>} : vector<8x4xf32>, vector<4x256xf32>, vector<8x256xf32> -> vector<8x256xf32>
    %c0_3 = arith.constant 0 : index
    %c0_4 = arith.constant 0 : index
    %3 = vector.load %arg2[%c0_3, %c0_4] : memref<8x1xf32, #tpu.memory_space<vmem>>, vector<8x1xf32>
    %4 = vector.broadcast %3 : vector<8x1xf32> to vector<8x256xf32>
    %5 = arith.addf %2, %4 : vector<8x256xf32>
    %cst_5 = arith.constant dense<0.000000e+00> : vector<8xf32>
    %6 = vector.multi_reduction <add>, %5, %cst_5 [1] : vector<8x256xf32> to vector<8xf32>
    %7 = vector.shape_cast %6 : vector<8xf32> to vector<8x1xf32>
    %cst_6 = arith.constant 3.906250e-03 : f32
    %8 = vector.broadcast %cst_6 : f32 to vector<8x1xf32>
    %9 = arith.mulf %7, %8 : vector<8x1xf32>
    %10 = arith.mulf %5, %5 : vector<8x256xf32>
    %cst_7 = arith.constant dense<0.000000e+00> : vector<8xf32>
    %11 = vector.multi_reduction <add>, %10, %cst_7 [1] : vector<8x256xf32> to vector<8xf32>
    %12 = vector.shape_cast %11 : vector<8xf32> to vector<8x1xf32>
    %cst_8 = arith.constant 3.906250e-03 : f32
    %13 = vector.broadcast %cst_8 : f32 to vector<8x1xf32>
    %14 = arith.mulf %12, %13 : vector<8x1xf32>
    %15 = arith.mulf %9, %9 : vector<8x1xf32>
    %16 = arith.subf %14, %15 : vector<8x1xf32>
    %cst_9 = arith.constant 0.000000e+00 : f32
    %17 = vector.broadcast %cst_9 : f32 to vector<8x1xf32>
    %18 = arith.maximumf %16, %17 : vector<8x1xf32>
    %c0_10 = arith.constant 0 : index
    %c0_11 = arith.constant 0 : index
    %19 = vector.load %arg3[%c0_10, %c0_11] : memref<8x1xf32, #tpu.memory_space<vmem>>, vector<8x1xf32>
    %cst_12 = arith.constant 9.99999974E-6 : f32
    %20 = vector.broadcast %cst_12 : f32 to vector<8x1xf32>
    %21 = arith.addf %18, %20 : vector<8x1xf32>
    %22 = math.rsqrt %21 : vector<8x1xf32>
    %23 = arith.mulf %19, %22 : vector<8x1xf32>
    %c0_13 = arith.constant 0 : index
    %c0_14 = arith.constant 0 : index
    %24 = vector.load %arg4[%c0_13, %c0_14] : memref<8x1xf32, #tpu.memory_space<vmem>>, vector<8x1xf32>
    %25 = arith.mulf %23, %9 : vector<8x1xf32>
    %26 = arith.subf %24, %25 : vector<8x1xf32>
    %c0_15 = arith.constant 0 : index
    %c0_16 = arith.constant 0 : index
    %27 = vector.load %arg5[%c0_15, %c0_16] : memref<8x256xf32, #tpu.memory_space<vmem>>, vector<8x256xf32>
    %28 = vector.broadcast %23 : vector<8x1xf32> to vector<8x256xf32>
    %29 = arith.mulf %28, %5 : vector<8x256xf32>
    %30 = arith.addf %27, %29 : vector<8x256xf32>
    %31 = vector.broadcast %26 : vector<8x1xf32> to vector<8x256xf32>
    %32 = arith.addf %30, %31 : vector<8x256xf32>
    %cst_17 = arith.constant 0.000000e+00 : f32
    %33 = vector.broadcast %cst_17 : f32 to vector<8x256xf32>
    %34 = arith.maximumf %32, %33 : vector<8x256xf32>
    %c0_18 = arith.constant 0 : index
    %c0_19 = arith.constant 0 : index
    %35 = vector.load %arg6[%c0_18, %c0_19] : memref<8x256xf32, #tpu.memory_space<vmem>>, vector<8x256xf32>
    tpu.vector_store %arg6[%c0_18, %c0_19], %34 {strides = array<i32>} : memref<8x256xf32, #tpu.memory_space<vmem>>, vector<8x256xf32>,
    return
  }
}

</mosaic_0001>

<bundles_post_ra>
// kernel: shortcut_layer.1
= control target key start
LH: loop header
LB: loop body
LE: loop exit
PB: predicated region body
PF: predicated region fallthrough
CT: control target
= control target key end

     0   :  { %vm38_vm0 = vcmask 1043456   ;;  %v205_v2 = vmov 0.0   ;;  %v206_v3 = vmov 0   ;;  %s276_s0 = inlined_call_operand.vmem [shape: f32[4,256], index: 0, kind: input, shape index: {}]   ;;  %s277_s1 = inlined_call_operand.vmem [shape: f32[8,4], index: 1, kind: input, shape index: {}]   ;;  %s278_s2 = inlined_call_operand.vmem [shape: f32[8,1], index: 2, kind: input, shape index: {}]   ;;  %s279_s3 = inlined_call_operand.vmem [shape: f32[8,1], index: 3, kind: input, shape index: {}]   ;;  %s280_s4 = inlined_call_operand.vmem [shape: f32[8,1], index: 4, kind: input, shape index: {}]   ;;  %s281_s5 = inlined_call_operand.vmem [shape: f32[8,256], index: 5, kind: input, shape index: {}]   ;;  %s282_s6 = inlined_call_operand.hbm [shape: f32[8,256], index: 6, kind: output, shape index: {}]  }
   0x1   :  { %v25_v0 = vld [vmem:[%s276_s0] sm:$0xff]  ;;  %107 = vmatprep.mubr.f32.mxu0 %v205_v2  ;;  %176 = vset.pattern.permute.xlu0 %v206_v3 }
   0x2   :  { %v33_v1 = vcombine.high %v25_v0, %v25_v0  ;;  %v26_v4 = vld [vmem:[%s278_s2] sm:$0xff] }
   0x3   :  { %11 = vsyncpa [#allocation3], 0  ;;  %v24_v5 = vld [vmem:[%s277_s1] sm:$0xff]  ;;  %vm34_vm1 = vcmask 31744   ;;  %29 = vperm.xlu0 %176, %v26_v4   ;;  %177 = vset.pattern.permute.xlu1 %v206_v3  ;;  %v135_v31 = vld [vmem:[%s281_s5 + $0x8] sm:$0xff] }
   0x4   :  { %170 = vmatprep.subr.msk.mxu0 %vm38_vm0, %v33_v1  ;;  %v127_v23 = vld [vmem:[%s279_s3] sm:$0xff]  ;;  %s207_s3 = smov [#allocation2]  }
   0x5   :  { %171 = vmatpush1.msk.msra.mxu0 %vm38_vm0, %v25_v0  ;;  %v131_v26 = vld [vmem:[%s280_s4] sm:$0xff]  ;;  %s162_s4 = sshll.u32 %s207_s3, 4  ;;  %s163_s4 = int_to_ptr.vmem [resolvable:$true] %s162_s4 }
   0x6   :  { %172 = vmatmul.mubr.msk.f32.vlgmr.msra.gmra.mrb[0].mxu0 %vm34_vm1, %v24_v5  ;;  %v134_v30 = vld [vmem:[%s281_s5] sm:$0xff]  ;;  %s181_s8 = scalar_lea.vmem %s163_s4, 256  ;;  %p186_p1 = scmp.lt.s32.totalorder %s163_s4, %s163_s4 }
   0x7   :  { %p182_p0 = scmp.ne.s32.totalorder %s163_s4, %s181_s8  ;;  %p187_p2 = scmp.lt.s32.totalorder %s181_s8, %s181_s8 }
   0x9   :  { %p188_p3 = por %p187_p2, %p186_p1 }
   0xb   :  { %p189_p4 = pnand %p188_p3, %p182_p0 }
  0x82   :  { %v30_v6 = vpop.permute.xlu0 %29 }
  0xd9   :  { %v109_v7 = vpop.f32.mrb[0].mxu0 }
  0xda   :  { %v110_v8 = vadd.f32 %v109_v7, %v30_v6  ;;  %v111_v9 = vpop.f32.mrb[1].mxu0 }
  0xdb   :  { %v112_v10 = vadd.f32 %v111_v9, %v30_v6 }
  0xdc   :  { %v118_v11 = vmul.f32 %v110_v8, %v110_v8 }
  0xdd   :  { %v114_v12 = vadd.f32 %v112_v10, %v110_v8  ;;  %v119_v13 = vmul.f32 %v112_v10, %v112_v10 }
  0xdf   :  { %115 = vadd.xlane.f32.xlu0 %v114_v12  ;;  %v120_v14 = vadd.f32 %v119_v13, %v118_v11 }
  0xe1   :  { %121 = vadd.xlane.f32.xlu1 %v120_v14 }
 0x16c   :  { %v116_v15 = vpop.xlane.xlu0 %115 }
 0x16d   :  { %v117_v16 = vmul.f32 0.00390625, %v116_v15 }
 0x16e   :  { %v122_v17 = vpop.xlane.xlu1 %121 }
 0x16f   :  { %v124_v18 = vmul.f32 %v117_v16, %v117_v16  ;;  %v123_v19 = vmul.f32 0.00390625, %v122_v17 }
 0x171   :  { %v125_v20 = vsub.f32 %v123_v19, %v124_v18 }
 0x173   :  { %v126_v21 = vmax.f32 %v125_v20, 0.0 }
 0x175   :  { %v128_v22 = vadd.f32 1e-05, %v126_v21 }
 0x177   :  { %179 = vrsqrt.f32 %v128_v22 }
 0x181   :  { %v180_v24 = vpop.eup %179 }
 0x182   :  { %v130_v25 = vmul.f32 %v180_v24, %v127_v23 }
 0x184   :  { %138 = vperm.xlu1 %177, %v130_v25   ;;  %v132_v27 = vmul.f32 %v130_v25, %v117_v16 }
 0x186   :  { %v133_v28 = vsub.f32 %v131_v26, %v132_v27 }
 0x188   :  { %147 = vperm.xlu1 %177, %v133_v28  }
 0x203   :  { %v139_v29 = vpop.permute.xlu1 %138 }
 0x204   :  { %v141_v32 = vmul.f32 %v139_v29, %v110_v8  ;;  %v142_v33 = vmul.f32 %v139_v29, %v112_v10 }
 0x206   :  { %v143_v34 = vadd.f32 %v141_v32, %v134_v30  ;;  %v144_v35 = vadd.f32 %v142_v33, %v135_v31 }
 0x207   :  { %v148_v36 = vpop.permute.xlu1 %147 }
 0x208   :  { %v150_v37 = vadd.f32 %v148_v36, %v143_v34  ;;  %v151_v38 = vadd.f32 %v148_v36, %v144_v35 }
 0x20a   :  { %v152_v39 = vmax.f32 %v150_v37, 0.0  ;;  %v153_v40 = vmax.f32 %v151_v38, 0.0 }
 0x20c   :  { %154 = vst [vmem:[#allocation2] sm:$0xff] %v152_v39  ;;  %155 = vst [vmem:[#allocation2 + $0x8] sm:$0xff] %v153_v40 }
 0x20d   :  { %192 = shalt.err (!%p189_p4)
}
 0x20e   :  { %s193_s10 = scalar_lea.hbm %s282_s6, 256 }
 0x20f   :  { %p194_p5 = scmp.ne.s32.totalorder %s282_s6, %s193_s10  ;;  %p197_p6 = scmp.lt.u32.totalorder %s193_s10, %s282_s6 }
 0x211   :  { %p199_p7 = pnand %p197_p6, %p194_p5 }
 0x213   :  { %202 = shalt.err (!%p199_p7)
}
 0x214   :  { %165 = dma.vmem_to_hbm [thread:$0]  %s163_s4, 256, %s282_s6, [#allocation3]  }
 0x215   :  { %203 = dma.done.wait [#allocation3], 256  }
 0x216   :  { %204 = vsyncadd [#allocation3], 4294967040 }
 0x217   :  { %169 = vsyncpa [#allocation3], 1 }

</bundles_post_ra>
